<compile_context>
chip_gen: v7x
topology: tpu7x:2x2x1
jax: 0.10.0
libtpu: 0.0.40
codegen_flags: <defaults>
</compile_context>

<pallas_src>
import functools

import jax
import jax.numpy as jnp
from jax.experimental import pallas as pl
from jax.experimental.pallas import tpu as pltpu  # noqa: F401  (TPU backend params if needed)

# ----------------------------- small config ---------------------------------
BATCH   = 2     # batch size of `inputs`
N_OUT   = 32    # feature dim of `inputs` (answer-embedding dim)
N_CANDS = 16    # number of answer candidates (len(av2i))

FP = jnp.float32


# ------------------------------ Pallas kernel --------------------------------
def _answer_selector_kernel(x_ref, wt_ref, o_ref):
    """Fused: similarity = x @ w (MXU, f32 accumulate) + stable log_softmax.

    x_ref : (B, D)   inputs
    wt_ref: (D, N)   glove_cands already transposed on the host
    o_ref : (B, N)   log-probabilities
    """
    sim = jnp.dot(x_ref[...], wt_ref[...], preferred_element_type=jnp.float32)
    m = jnp.max(sim, axis=-1, keepdims=True)
    s = sim - m
    lse = jnp.log(jnp.sum(jnp.exp(s), axis=-1, keepdims=True))
    o_ref[...] = (s - lse).astype(o_ref.dtype)


# ------------------------------ wrapper --------------------------------------
@functools.partial(jax.jit, static_argnums=())
def answer_selector(inputs, glove_cands):
    """inputs: (B, D) float32; glove_cands: (N_cands, D) float32 (as in PyTorch)."""
    B, D = inputs.shape
    N = glove_cands.shape[0]
    wt = glove_cands.T  # (D, N): host-side one-time transpose of a constant

    return pl.pallas_call(
        _answer_selector_kernel,
        out_shape=jax.ShapeDtypeStruct((B, N), inputs.dtype),
        # No grid / BlockSpecs: full-array blocks — operands are a few KB and
        # fit trivially in VMEM on v5e / v6e / v7x, so one launch, zero
        # intermediate HBM traffic.
    )(inputs, wt)


# -------------------------------- main ----------------------------------------
if __name__ == "__main__":
    key = jax.random.PRNGKey(0)
    k_in, k_cands = jax.random.split(key, 2)

    # Deterministic stand-ins for the file-loaded data / upstream activations.
    inputs = jax.random.normal(k_in, (BATCH, N_OUT), FP)              # model output
    glove_cands = jax.random.normal(k_cands, (N_CANDS, N_OUT), FP) * 0.1

    pred = answer_selector(inputs, glove_cands)
    pred = jax.block_until_ready(pred)

    # --- sanity checks against the reference semantics -----------------------
    ref_sim = inputs @ glove_cands.T
    ref = jax.nn.log_softmax(ref_sim, axis=1)

    assert pred.shape == (BATCH, N_CANDS)
    assert bool(jnp.all(jnp.isfinite(pred)))
    # log-softmax rows exponentiate-and-sum to 1
    assert bool(jnp.allclose(jnp.sum(jnp.exp(pred), axis=1), 1.0, atol=1e-5))
    # matches a pure-JAX reference of the PyTorch forward
    assert bool(jnp.allclose(pred, ref, atol=1e-5, rtol=1e-5))

    print("KERNEL_OK")
</pallas_src>

<mosaic_0001>
module attributes {stable_mosaic.version = 11 : i64} {
  func.func @_answer_selector_kernel(%arg0: memref<2x32xf32, #tpu.memory_space<vmem>>, %arg1: memref<32x16xf32, #tpu.memory_space<vmem>>, %arg2: memref<2x16xf32, #tpu.memory_space<vmem>>) attributes {dimension_semantics = [], scalar_prefetch = 0 : i64, scratch_operands = 0 : i64, tpu.core_type = #tpu.core_type<tc>} {
    %c0 = arith.constant 0 : index
    %c0_0 = arith.constant 0 : index
    %0 = vector.load %arg0[%c0, %c0_0] : memref<2x32xf32, #tpu.memory_space<vmem>>, vector<2x32xf32>
    %c0_1 = arith.constant 0 : index
    %c0_2 = arith.constant 0 : index
    %1 = vector.load %arg1[%c0_1, %c0_2] : memref<32x16xf32, #tpu.memory_space<vmem>>, vector<32x16xf32>
    %cst = arith.constant dense<0.000000e+00> : vector<2x16xf32>
    %2 = tpu.matmul %0, %1, %cst {dimension_numbers = #tpu.dot_dimension_numbers<[1], [0], [0], [1], [0, 0, 1, 1], [], []>} : vector<2x32xf32>, vector<32x16xf32>, vector<2x16xf32> -> vector<2x16xf32>
    %cst_3 = arith.constant dense<0xFF800000> : vector<2xf32>
    %3 = vector.multi_reduction <maximumf>, %2, %cst_3 [1] : vector<2x16xf32> to vector<2xf32>
    %4 = vector.shape_cast %3 : vector<2xf32> to vector<2x1xf32>
    %5 = vector.broadcast %4 : vector<2x1xf32> to vector<2x16xf32>
    %6 = arith.subf %2, %5 : vector<2x16xf32>
    %7 = math.exp %6 : vector<2x16xf32>
    %cst_4 = arith.constant dense<0.000000e+00> : vector<2xf32>
    %8 = vector.multi_reduction <add>, %7, %cst_4 [1] : vector<2x16xf32> to vector<2xf32>
    %9 = vector.shape_cast %8 : vector<2xf32> to vector<2x1xf32>
    %10 = math.log %9 : vector<2x1xf32>
    %11 = vector.broadcast %10 : vector<2x1xf32> to vector<2x16xf32>
    %12 = arith.subf %6, %11 : vector<2x16xf32>
    %c0_5 = arith.constant 0 : index
    %c0_6 = arith.constant 0 : index
    %13 = vector.load %arg2[%c0_5, %c0_6] : memref<2x16xf32, #tpu.memory_space<vmem>>, vector<2x16xf32>
    tpu.vector_store %arg2[%c0_5, %c0_6], %12 {strides = array<i32>} : memref<2x16xf32, #tpu.memory_space<vmem>>, vector<2x16xf32>,
    return
  }
}

</mosaic_0001>

<bundles_post_ra>
// kernel: answer_selector.1
= control target key start
LH: loop header
LB: loop body
LE: loop exit
PB: predicated region body
PF: predicated region fallthrough
CT: control target
= control target key end

     0   :  { %v174_v3 = vmov 0.0|0.0   ;;  %vm175_vm0 = vmmov 0   ;;  %v176_v6 = vmov 0.0   ;;  %s223_s0 = inlined_call_operand.vmem [shape: f32[2,32], index: 0, kind: input, shape index: {}]   ;;  %s224_s1 = inlined_call_operand.vmem [shape: f32[32,16], index: 1, kind: input, shape index: {}]   ;;  %s225_s2 = inlined_call_operand.hbm [shape: f32[2,16], index: 2, kind: output, shape index: {}]  }
   0x1   :  { %v13_v0 = vld [vmem:[%s224_s1] sm:$0xff]  ;;  %v14_v1 = vld [vmem:[%s224_s1 + $0x8] sm:$0xff]  ;;  %v15_v2 = vld [vmem:[%s224_s1 + $0x10] sm:$0xff]  ;;  %136 = vmatprep.subr.bf16.mxu0 %v174_v3  ;;  %133 = vmatprep.mubr.msk.f32.mxu0 %vm175_vm0, %v176_v6 }
   0x2   :  { %v137_v4 = vpack.c.bf16 %v14_v1, %v13_v0  ;;  %v16_v5 = vld [vmem:[%s224_s1 + $0x18] sm:$0xff] }
   0x3   :  { %7 = vsyncpa [#allocation3], 0  ;;  %v140_v7 = vpack.c.bf16 %v16_v5, %v15_v2  ;;  %v12_v8 = vld [vmem:[%s223_s0] sm:$0x3]  ;;  %vm17_vm1 = vcmask 261120   ;;  %vm91_vm2 = vcmask 123904  }
   0x4   :  { %138 = vmatpush3.bf16.msra.mxu0 %v137_v4  ;;  %s177_s0 = smov [#allocation2]  }
   0x5   :  { %139 = vmatprep.subr.bf16.mxu0 %v174_v3  ;;  %s111_s1 = sshll.u32 %s177_s0, 4  ;;  %s112_s1 = int_to_ptr.vmem [resolvable:$true] %s111_s1 }
   0x6   :  { %s150_s19 = scalar_lea.vmem %s112_s1, 32  ;;  %p155_p1 = scmp.lt.s32.totalorder %s112_s1, %s112_s1 }
   0x7   :  { %p151_p0 = scmp.ne.s32.totalorder %s112_s1, %s150_s19  ;;  %p156_p2 = scmp.lt.s32.totalorder %s150_s19, %s150_s19 }
   0x8   :  { %141 = vmatpush3.bf16.msra.mxu0 %v140_v7 }
   0x9   :  { %p157_p3 = por %p156_p2, %p155_p1 }
   0xb   :  { %134 = vmatmul.mubr.msk.f32.vlgmr.msra.gmra.mrb[0].mxu0 %vm17_vm1, %v12_v8  ;;  %p158_p4 = pnand %p157_p3, %p151_p0 }
  0xde   :  { %v87_v9 = vpop.f32.mrb[0].mxu0 }
  0xdf   :  { %v135_v10 = vpop.f32.mrb[1].mxu0  ;;  %v92_v11 = vsel %vm91_vm2, %v87_v9, -inf }
  0xe0   :  { %93 = vmax.xlane.f32.xlu0 %v92_v11 }
 0x16d   :  { %v94_v12 = vpop.xlane.xlu0 %93 }
 0x16e   :  { %v95_v13 = vsub.f32 %v87_v9, %v94_v12 }
 0x170   :  { %v96_v14 = vmul.f32 1.442695, %v95_v13 }
 0x172   :  { %146 = vpow2.f32 %v96_v14 }
 0x17c   :  { %v147_v15 = vpop.eup %146 }
 0x17d   :  { %v98_v16 = vsel %vm91_vm2, %v147_v15, 0.0 }
 0x17e   :  { %99 = vadd.xlane.f32.xlu0 %v98_v16 }
 0x20b   :  { %v100_v17 = vpop.xlane.xlu0 %99 }
 0x20c   :  { %148 = vlog2.f32 %v100_v17 }
 0x216   :  { %v149_v18 = vpop.eup %148 }
 0x217   :  { %v102_v19 = vmul.f32 0.6931472, %v149_v18 }
 0x219   :  { %v103_v20 = vsub.f32 %v95_v13, %v102_v19 }
 0x21b   :  { %104 = vst.msk [vmem:[#allocation2] sm:$0x3] %vm91_vm2, %v103_v20 }
 0x21c   :  { %161 = shalt.err (!%p158_p4)
}
 0x21d   :  { %s162_s22 = scalar_lea.hbm %s225_s2, 32 }
 0x21e   :  { %p163_p5 = scmp.ne.s32.totalorder %s225_s2, %s162_s22  ;;  %p166_p6 = scmp.lt.u32.totalorder %s162_s22, %s225_s2 }
 0x220   :  { %p168_p7 = pnand %p166_p6, %p163_p5 }
 0x222   :  { %171 = shalt.err (!%p168_p7)
}
 0x223   :  { %114 = dma.vmem_to_hbm [thread:$0]  %s112_s1, 32, %s225_s2, [#allocation3]  }
 0x224   :  { %172 = dma.done.wait [#allocation3], 32  }
 0x225   :  { %173 = vsyncadd [#allocation3], 4294967264 }
 0x226   :  { %118 = vsyncpa [#allocation3], 1 }

</bundles_post_ra>
